<compile_context>
chip_gen: v7x
topology: tpu7x:2x2x1
jax: 0.10.0
libtpu: 0.0.40
codegen_flags: <defaults>
</compile_context>

<pallas_src>
import jax
import jax.numpy as jnp
from jax.experimental import pallas as pl
from jax.experimental.pallas import tpu as pltpu


def _round_up(n, m):
    return ((n + m - 1) // m) * m


def _vmem_budget_bytes(headroom=16 << 20):
    """Per-generation VMEM budget: physical capacity minus headroom for Mosaic
    internal scratch (v5e/v6e: 128 MiB -> ~112 MiB, v7x: 64 MiB -> ~48 MiB)."""
    try:
        cap = int(pltpu.get_tpu_info().vmem_capacity_bytes)
    except Exception:
        cap = 64 << 20  # conservative fallback valid on every generation
    return max(cap - headroom, 32 << 20)


def _choose_tb(B, Hp, w_bytes, vmem_budget):
    """Largest batch tile (multiple of 8, <=1024) whose double-buffered x/out tiles
    plus in-kernel temporaries fit next to the single-buffered resident weights."""
    resident = 2 * Hp * Hp * w_bytes + 2 * Hp * 4          # W1^T + W2^T + b1 + b2
    # per batch-row cost: x tile bf16 x2 bufs + out tile f32 x2 bufs
    # + ~4 f32-sized temporaries (h, h->bf16 cast, matmul out, x upcast).
    per_row = Hp * (2 * 2 + 2 * 4 + 4 * 4)
    avail = vmem_budget - resident - (2 << 20)
    if avail <= per_row * 8:
        # Weights (nearly) exhaust the budget: needs the K-split (see TODO above).
        return 8
    tb = avail // per_row
    tb = min(tb, 1024, _round_up(B, 8))
    return int(max(8, (tb // 8) * 8))


def _resblock_kernel(a_ref, x_ref, w1t_ref, b1_ref, w2t_ref, b2_ref, o_ref):
    # a_ref   : SMEM (1, 1) scalar for AdaptiveTanh
    # x_ref   : (tb, Hp) bf16 input tile (streamed)
    # w1t_ref : (Hp, Hp) layer1.weight^T (bf16), VMEM-resident, single-buffered
    # b1_ref  : (1, Hp)  f32
    # w2t_ref : (Hp, Hp) layer2.weight^T (bf16), VMEM-resident, single-buffered
    # b2_ref  : (1, Hp)  f32
    # o_ref   : (tb, Hp) f32 output tile
    a = a_ref[0, 0]
    # Read x_ref at each use site (matmul input, residual) instead of binding the
    # whole tile once -> lower vreg/VMEM live-range pressure at large tb.
    h = jnp.dot(x_ref[...], w1t_ref[...],
                preferred_element_type=jnp.float32)        # MXU: bf16 in, f32 acc
    h = jnp.tanh(a * (h + b1_ref[...]))                    # f32 epilogue (EUP tanh)
    out = jnp.dot(h.astype(w2t_ref.dtype), w2t_ref[...],
                  preferred_element_type=jnp.float32)
    o_ref[...] = (out + b2_ref[...]
                  + x_ref[...].astype(jnp.float32)).astype(o_ref.dtype)


def prepare_params(w1, b1, w2, b2, a, *, compute_dtype=jnp.bfloat16):
    """One-time parameter prep (do NOT repeat per forward call): transpose weights
    to [in, out], zero-pad the feature dim to a multiple of 128 (lane-dense), and
    cast the matmul operands to `compute_dtype`."""
    H = w1.shape[0]
    Hp = _round_up(H, 128)
    w1f = jnp.asarray(w1, jnp.float32)
    w2f = jnp.asarray(w2, jnp.float32)
    w1t = jnp.zeros((Hp, Hp), compute_dtype).at[:H, :H].set(w1f.T.astype(compute_dtype))
    w2t = jnp.zeros((Hp, Hp), compute_dtype).at[:H, :H].set(w2f.T.astype(compute_dtype))
    b1p = jnp.zeros((1, Hp), jnp.float32).at[0, :H].set(jnp.asarray(b1, jnp.float32))
    b2p = jnp.zeros((1, Hp), jnp.float32).at[0, :H].set(jnp.asarray(b2, jnp.float32))
    a_sc = jnp.asarray(a, jnp.float32).reshape(1, 1)
    return {"w1t": w1t, "b1": b1p, "w2t": w2t, "b2": b2p, "a": a_sc}


def residual_block_apply(params, x, *, tb=None):
    """x: [B, H] float; params from prepare_params(). Returns [B, H] in x.dtype."""
    B, H = x.shape
    Hp = params["w1t"].shape[0]
    assert H <= Hp
    cdtype = params["w1t"].dtype            # matmul / streaming dtype (bf16)
    w_bytes = cdtype.itemsize
    vmem_budget = _vmem_budget_bytes()

    if tb is None:
        tb = _choose_tb(B, Hp, w_bytes, vmem_budget)
    tb = max(8, _round_up(min(int(tb), max(B, 8)), 8))
    Bp = _round_up(B, tb)

    # Stream the activation in the compute dtype; pad only when actually needed so
    # the aligned production case skips the extra HBM read+write entirely.
    need_pad = (Bp != B) or (Hp != H)
    if need_pad:
        xp = jnp.zeros((Bp, Hp), cdtype).at[:B, :H].set(x.astype(cdtype))
    else:
        xp = x.astype(cdtype)

    grid = (Bp // tb,)

    # Honest VMEM accounting: single-buffered resident weights/biases,
    # double-buffered x (bf16) / out (f32) tiles, in-kernel temporaries, slack.
    vmem_bytes = (2 * Hp * Hp * w_bytes          # W1^T + W2^T (single-buffered)
                  + 2 * Hp * 4                   # b1 + b2 (single-buffered)
                  + 2 * tb * Hp * w_bytes        # x tile, double-buffered
                  + 2 * tb * Hp * 4              # out tile, double-buffered
                  + 4 * tb * Hp * 4              # h / casts / residual temporaries
                  + (2 << 20))                   # slack for Mosaic internal scratch
    vmem_limit = int(min(max(vmem_bytes, 4 << 20), vmem_budget))

    cost = pl.CostEstimate(
        flops=int(2 * 2 * Bp * Hp * Hp),
        transcendentals=int(Bp * Hp),
        bytes_accessed=int(2 * Hp * Hp * w_bytes
                           + Bp * Hp * (w_bytes + 4)
                           + 2 * Hp * 4 + 4),
    )

    out = pl.pallas_call(
        _resblock_kernel,
        out_shape=jax.ShapeDtypeStruct((Bp, Hp), jnp.float32),
        grid_spec=pltpu.PrefetchScalarGridSpec(
            num_scalar_prefetch=0,
            grid=grid,
            in_specs=[
                pl.BlockSpec(memory_space=pltpu.MemorySpace.SMEM),      # a (scalar)
                pl.BlockSpec((tb, Hp), lambda i: (i, 0)),               # x (pipelined)
                pl.BlockSpec((Hp, Hp), lambda i: (0, 0),
                             pipeline_mode=pl.Buffered(1)),             # W1^T resident
                pl.BlockSpec((1, Hp), lambda i: (0, 0),
                             pipeline_mode=pl.Buffered(1)),             # b1 resident
                pl.BlockSpec((Hp, Hp), lambda i: (0, 0),
                             pipeline_mode=pl.Buffered(1)),             # W2^T resident
                pl.BlockSpec((1, Hp), lambda i: (0, 0),
                             pipeline_mode=pl.Buffered(1)),             # b2 resident
            ],
            out_specs=pl.BlockSpec((tb, Hp), lambda i: (i, 0)),
        ),
        compiler_params=pltpu.CompilerParams(
            dimension_semantics=("parallel",),
            vmem_limit_bytes=vmem_limit,
        ),
        cost_estimate=cost,
    )(params["a"], xp, params["w1t"], params["b1"], params["w2t"], params["b2"])

    if need_pad:
        out = out[:B, :H]
    return out.astype(x.dtype)


def residual_block(x, w1, b1, w2, b2, a, *, compute_dtype=jnp.bfloat16, tb=None):
    """Convenience wrapper. w1/w2 in PyTorch nn.Linear convention [out, in]."""
    params = prepare_params(w1, b1, w2, b2, a, compute_dtype=compute_dtype)
    return residual_block_apply(params, x, tb=tb)


def _reference(x, w1, b1, w2, b2, a, compute_dtype=jnp.float32):
    cd = compute_dtype
    h = jnp.dot(x.astype(cd), w1.T.astype(cd),
                preferred_element_type=jnp.float32) + b1
    h = jnp.tanh(a * h)
    out = jnp.dot(h.astype(cd), w2.T.astype(cd),
                  preferred_element_type=jnp.float32) + b2
    return out + x


if __name__ == "__main__":
    key = jax.random.PRNGKey(0)
    B, H = 48, 32   # small test shape; H is padded to 128 lanes inside the wrapper

    kx, k1, k2 = jax.random.split(key, 3)
    x = jax.random.normal(kx, (B, H), jnp.float32)

    # xavier_normal_ for square Linear: std = sqrt(2 / (fan_in + fan_out)) = sqrt(1/H)
    std = (1.0 / H) ** 0.5
    w1 = jax.random.normal(k1, (H, H), jnp.float32) * std   # layer1.weight [out, in]
    b1 = jnp.zeros((H,), jnp.float32)
    w2 = jax.random.normal(k2, (H, H), jnp.float32) * std   # layer2.weight [out, in]
    b2 = jnp.zeros((H,), jnp.float32)
    a = 10.0                                                 # AdaptiveTanh default n=10

    params = prepare_params(w1, b1, w2, b2, a)               # one-time prep (hoisted)
    out = residual_block_apply(params, x, tb=16)             # grid=(3,): exercises pipelining
    jax.block_until_ready(out)

    # Reference with the same bf16 matmul inputs / f32 accumulation; the kernel
    # additionally streams x (and hence the residual) in bf16, hence the 2e-2 tol.
    ref = _reference(x, w1, b1, w2, b2, a, compute_dtype=jnp.bfloat16)
    assert out.shape == (B, H)
    assert out.dtype == x.dtype
    assert jnp.allclose(out, ref, atol=2e-2, rtol=2e-2), "mismatch vs reference"

    print("KERNEL_OK")
</pallas_src>

<mosaic_0001>
module attributes {stable_mosaic.version = 11 : i64} {
  func.func @_resblock_kernel(%arg0: i32, %arg1: memref<1x1xf32, #tpu.memory_space<smem>>, %arg2: memref<16x128xbf16, #tpu.memory_space<vmem>>, %arg3: memref<128x128xbf16, #tpu.memory_space<vmem>>, %arg4: memref<1x128xf32, #tpu.memory_space<vmem>>, %arg5: memref<128x128xbf16, #tpu.memory_space<vmem>>, %arg6: memref<1x128xf32, #tpu.memory_space<vmem>>, %arg7: memref<16x128xf32, #tpu.memory_space<vmem>>) attributes {dimension_semantics = [#tpu.dimension_semantics<parallel>], iteration_bounds = array<i64: 3>, scalar_prefetch = 0 : i64, scratch_operands = 0 : i64, tpu.core_type = #tpu.core_type<tc>, window_params = [{transform_indices = @transform_0, window_bounds = array<i64: 1, 1>}, {transform_indices = @transform_1, window_bounds = array<i64: 16, 128>}, {pipeline_mode = #tpu.pipeline_mode<synchronous>, transform_indices = @transform_2, window_bounds = array<i64: 128, 128>}, {pipeline_mode = #tpu.pipeline_mode<synchronous>, transform_indices = @transform_3, window_bounds = array<i64: 1, 128>}, {pipeline_mode = #tpu.pipeline_mode<synchronous>, transform_indices = @transform_4, window_bounds = array<i64: 128, 128>}, {pipeline_mode = #tpu.pipeline_mode<synchronous>, transform_indices = @transform_5, window_bounds = array<i64: 1, 128>}, {transform_indices = @transform_6, window_bounds = array<i64: 16, 128>}]} {
    %c0 = arith.constant 0 : index
    %c0_0 = arith.constant 0 : index
    %0 = memref.load %arg1[%c0, %c0_0] : memref<1x1xf32, #tpu.memory_space<smem>>
    %c0_1 = arith.constant 0 : index
    %c0_2 = arith.constant 0 : index
    %1 = vector.load %arg2[%c0_1, %c0_2] : memref<16x128xbf16, #tpu.memory_space<vmem>>, vector<16x128xbf16>
    %c0_3 = arith.constant 0 : index
    %c0_4 = arith.constant 0 : index
    %2 = vector.load %arg3[%c0_3, %c0_4] : memref<128x128xbf16, #tpu.memory_space<vmem>>, vector<128x128xbf16>
    %cst = arith.constant dense<0.000000e+00> : vector<16x128xf32>
    %3 = tpu.matmul %1, %2, %cst {dimension_numbers = #tpu.dot_dimension_numbers<[1], [0], [0], [1], [0, 0, 1, 1], [], []>} : vector<16x128xbf16>, vector<128x128xbf16>, vector<16x128xf32> -> vector<16x128xf32>
    %c0_5 = arith.constant 0 : index
    %c0_6 = arith.constant 0 : index
    %4 = vector.load %arg4[%c0_5, %c0_6] : memref<1x128xf32, #tpu.memory_space<vmem>>, vector<1x128xf32>
    %5 = vector.broadcast %4 : vector<1x128xf32> to vector<16x128xf32>
    %6 = arith.addf %3, %5 : vector<16x128xf32>
    %7 = vector.broadcast %0 : f32 to vector<16x128xf32>
    %8 = arith.mulf %7, %6 : vector<16x128xf32>
    %9 = math.tanh %8 : vector<16x128xf32>
    %10 = arith.truncf %9 : vector<16x128xf32> to vector<16x128xbf16>
    %c0_7 = arith.constant 0 : index
    %c0_8 = arith.constant 0 : index
    %11 = vector.load %arg5[%c0_7, %c0_8] : memref<128x128xbf16, #tpu.memory_space<vmem>>, vector<128x128xbf16>
    %cst_9 = arith.constant dense<0.000000e+00> : vector<16x128xf32>
    %12 = tpu.matmul %10, %11, %cst_9 {dimension_numbers = #tpu.dot_dimension_numbers<[1], [0], [0], [1], [0, 0, 1, 1], [], []>} : vector<16x128xbf16>, vector<128x128xbf16>, vector<16x128xf32> -> vector<16x128xf32>
    %c0_10 = arith.constant 0 : index
    %c0_11 = arith.constant 0 : index
    %13 = vector.load %arg6[%c0_10, %c0_11] : memref<1x128xf32, #tpu.memory_space<vmem>>, vector<1x128xf32>
    %14 = vector.broadcast %13 : vector<1x128xf32> to vector<16x128xf32>
    %15 = arith.addf %12, %14 : vector<16x128xf32>
    %c0_12 = arith.constant 0 : index
    %c0_13 = arith.constant 0 : index
    %16 = vector.load %arg2[%c0_12, %c0_13] : memref<16x128xbf16, #tpu.memory_space<vmem>>, vector<16x128xbf16>
    %17 = arith.extf %16 : vector<16x128xbf16> to vector<16x128xf32>
    %18 = arith.addf %15, %17 : vector<16x128xf32>
    %c0_14 = arith.constant 0 : index
    %c0_15 = arith.constant 0 : index
    %19 = vector.load %arg7[%c0_14, %c0_15] : memref<16x128xf32, #tpu.memory_space<vmem>>, vector<16x128xf32>
    tpu.vector_store %arg7[%c0_14, %c0_15], %18 {strides = array<i32>} : memref<16x128xf32, #tpu.memory_space<vmem>>, vector<16x128xf32>,
    return
  }
  func.func @transform_0(%arg0: i32) -> (i32, i32) {
    %c0_i32 = arith.constant 0 : i32
    %c0_i32_0 = arith.constant 0 : i32
    %c0_i32_1 = arith.constant 0 : i32
    return %c0_i32, %c0_i32_0 : i32, i32
  }
  func.func @transform_1(%arg0: i32) -> (i32, i32) {
    %c0_i32 = arith.constant 0 : i32
    %c0_i32_0 = arith.constant 0 : i32
    return %arg0, %c0_i32 : i32, i32
  }
  func.func @transform_2(%arg0: i32) -> (i32, i32) {
    %c0_i32 = arith.constant 0 : i32
    %c0_i32_0 = arith.constant 0 : i32
    %c0_i32_1 = arith.constant 0 : i32
    return %c0_i32, %c0_i32_0 : i32, i32
  }
  func.func @transform_3(%arg0: i32) -> (i32, i32) {
    %c0_i32 = arith.constant 0 : i32
    %c0_i32_0 = arith.constant 0 : i32
    %c0_i32_1 = arith.constant 0 : i32
    return %c0_i32, %c0_i32_0 : i32, i32
  }
  func.func @transform_4(%arg0: i32) -> (i32, i32) {
    %c0_i32 = arith.constant 0 : i32
    %c0_i32_0 = arith.constant 0 : i32
    %c0_i32_1 = arith.constant 0 : i32
    return %c0_i32, %c0_i32_0 : i32, i32
  }
  func.func @transform_5(%arg0: i32) -> (i32, i32) {
    %c0_i32 = arith.constant 0 : i32
    %c0_i32_0 = arith.constant 0 : i32
    %c0_i32_1 = arith.constant 0 : i32
    return %c0_i32, %c0_i32_0 : i32, i32
  }
  func.func @transform_6(%arg0: i32) -> (i32, i32) {
    %c0_i32 = arith.constant 0 : i32
    %c0_i32_0 = arith.constant 0 : i32
    return %arg0, %c0_i32 : i32, i32
  }
}

</mosaic_0001>

<bundles_post_ra>
// kernel: tpu_custom_call.1
= control target key start
LH: loop header
LB: loop body
LE: loop exit
PB: predicated region body
PF: predicated region fallthrough
CT: control target
= control target key end

     0   :  { %s1296_s0 = inlined_call_operand.<no memory space> [shape: f32[1,1], index: 0, kind: input, shape index: {}]   ;;  %s1297_s1 = inlined_call_operand.hbm [shape: bf16[48,128], index: 1, kind: input, shape index: {}]   ;;  %s1298_s2 = inlined_call_operand.hbm [shape: bf16[128,128], index: 2, kind: input, shape index: {}]   ;;  %s1299_s3 = inlined_call_operand.vmem [shape: f32[1,128], index: 3, kind: input, shape index: {}]   ;;  %s1300_s4 = inlined_call_operand.hbm [shape: bf16[128,128], index: 4, kind: input, shape index: {}]   ;;  %s1301_s5 = inlined_call_operand.vmem [shape: f32[1,128], index: 5, kind: input, shape index: {}]   ;;  %s1302_s6 = inlined_call_operand.hbm [shape: f32[48,128], index: 6, kind: output, shape index: {}]  }
   0x1   :  { %11 = sst [smem:[#allocation2]] %s1296_s0 }
   0x2   :  { %12 = vsyncpa [#allocation4], 0 }
   0x3   :  { %14 = vsyncpa [#allocation4 + $0x1], 0 }
   0x4   :  { %15 = vsyncpa [#allocation7], 0 }
   0x5   :  { %16 = vsyncpa [#allocation5], 0 }
   0x6   :  { %18 = vsyncpa [#allocation5 + $0x1], 0  ;;  %s1052_s23 = smov 0   ;;  %s1054_s24 = smov 0  }
   0x7   :  { %s1056_s25 = smov 0   ;;  %s1058_s26 = smov 0  }
   0x8 LB: > { %s1073_s0 = sadd.s32 4294967295, %s1002_s26   ;;  %s654_s27 = sadd.s32 4294967294, %s1002_s26   ;;  %s1002_s26 = sphi %s1058_s26, %s1321_s26   ;;  %s998_s25 = sphi %s1056_s25, %s1320_s25   ;;  %s994_s24 = sphi %s1054_s24, %s1319_s24   ;;  %s990_s23 = sphi %s1052_s23, %s1318_s23  }
   0x9   : > { %p65_p0 = scmp.ne.s32.totalorder %s994_s24, %s990_s23  ;;  %p1303_p1 = scmp.eq.s32.totalorder %s1073_s0, 0 }
   0xa   : > { %p179_p3 = scmp.eq.s32.totalorder %s654_s27, 2  ;;  %p655_p5 = scmp.ge.s32.totalorder %s1002_s26, 1 }
   0xb   : > { %p1082_p4 = por %p1303_p1, %p65_p0  ;;  %p186_p7 = scmp.lt.s32.totalorder %s1002_s26, 4 }
   0xc   : > { %p1087_p6 = por %p179_p3, %p65_p0  ;;  %s1004_s7 = smov [#allocation6]  }
   0xd   : > { %s1306_s28 = scalar_select %p1082_p4, 1, 0 }
   0xe   : > { %s1307_s29 = scalar_select %p1087_p6, 1, 0 }
   0xf   : > { %p1092_p8 = pnand %p655_p5, %p186_p7  ;;  %s201_s8 = sshll.u32 %s1004_s7, 4  ;;  %s202_s8 = int_to_ptr.vmem [resolvable:$true] %s201_s8 }
  0x10   : > { %s1005_s10 = smov [#allocation8]   ;;  %s846_s14 = scalar_lea.hbm %s1298_s2, 1024 }
  0x11   : > { %s1308_s30 = scalar_select %p1092_p8, 1, 0 }
  0x12   : > { %p763_p9 = pneg %p1092_p8  ;;  %s217_s11 = sshll.u32 %s1005_s10, 4  ;;  %s1104_s11 = int_to_ptr.vmem [resolvable:$true] %s217_s11 }
  0x13   : > { %p847_p11 = scmp.ne.s32.totalorder %s1298_s2, %s846_s14  ;;  %p853_p3 = scmp.lt.u32.totalorder %s846_s14, %s1298_s2 }
  0x14   : > { %p1100_p10 = pnand %p763_p9, %p1303_p1 }
  0x16   : > { %p848_p12 = pneg %p1100_p10 }
  0x18   : > { %p849_p13 = pnand %p848_p12, %p847_p11 }
  0x1a   : > { %p850_p0 = pneg %p849_p13 }
  0x1c   : > { %p855_p5 = pnand %p853_p3, %p850_p0 }
  0x1e   : > { %858 = shalt.err (!%p855_p5)
}
  0x1f   : > { %s859_s19 = scalar_lea.vmem %s202_s8, 1024  ;;  %p867_p2 = scmp.lt.s32.totalorder %s202_s8, %s202_s8 }
  0x20   : > { %p860_p7 = scmp.ne.s32.totalorder %s202_s8, %s859_s19  ;;  %p868_p6 = scmp.lt.s32.totalorder %s859_s19, %s859_s19 }
  0x22   : > { %p862_p9 = pnand %p860_p7, %p848_p12  ;;  %p869_p4 = por %p868_p6, %p867_p2 }
  0x24   : > { %p863_p1 = pneg %p862_p9 }
  0x26   : > { %p870_p8 = pnand %p869_p4, %p863_p1 }
  0x28   : > { %873 = shalt.err (!%p870_p8)
}
  0x29   : > { %s1006_s20 = smov 64   ;;  %s1007_s21 = smov 4  }
  0x2a   : > { %766 = dma.hbm_to_vmem [thread:$0]  (!%p1100_p10), %s1298_s2, 1024, %s202_s8, [#allocation7], %s1006_s20, %s1006_s20, %s1007_s21  }
  0x2b   : > { %s874_s12 = scalar_lea.hbm %s1300_s4, 1024 }
  0x2c   : > { %p875_p1 = scmp.ne.s32.totalorder %s1300_s4, %s874_s12  ;;  %p881_p6 = scmp.lt.u32.totalorder %s874_s12, %s1300_s4 }
  0x2e   : > { %p877_p2 = pnand %p875_p1, %p848_p12 }
  0x30   : > { %p878_p4 = pneg %p877_p2 }
  0x32   : > { %p883_p8 = pnand %p881_p6, %p878_p4 }
  0x34   : > { %886 = shalt.err (!%p883_p8)
}
  0x35   : > { %s887_s8 = scalar_lea.vmem %s1104_s11, 1024  ;;  %p895_p3 = scmp.lt.s32.totalorder %s1104_s11, %s1104_s11 }
  0x36   : > { %p888_p11 = scmp.ne.s32.totalorder %s1104_s11, %s887_s8  ;;  %p896_p5 = scmp.lt.s32.totalorder %s887_s8, %s887_s8 }
  0x38   : > { %p890_p13 = pnand %p888_p11, %p848_p12  ;;  %p897_p7 = por %p896_p5, %p895_p3 }
  0x3a   : > { %p891_p0 = pneg %p890_p13 }
  0x3c   : > { %p898_p9 = pnand %p897_p7, %p891_p0 }
  0x3e   : > { %901 = shalt.err (!%p898_p9)
}
  0x3f   : > { %769 = dma.hbm_to_vmem [thread:$0]  (!%p1100_p10), %s1300_s4, 1024, %s1104_s11, [#allocation7], %s1006_s20, %s1006_s20, %s1007_s21  }
  0x40   : > { %s1160_s9 = sadd.s32 1, %s1002_s26   ;;  %s52_s19 = sadd.s32 1, %s998_s25 }
  0x41   : > { %s49_s22 = ssub.s32 %s1002_s26, %s1160_s9  ;;  %p59_p12 = scmp.ne.s32.totalorder %s998_s25, %s994_s24 }
  0x42   : > { %p50_p1 = scmp.eq.s32.totalorder %s49_s22, 0  ;;  %p60_p2 = scmp.eq.s32.totalorder %s1002_s26, 0 }
  0x43   : > { %p1310_p4 = scmp.eq.s32.totalorder %s1073_s0, 2  ;;  %p780_p8 = scmp.lt.s32.totalorder %s1002_s26, 3 }
  0x44   : > { %s1176_s7 = scalar_select %p50_p1, %s998_s25, %s52_s19  }
  0x45   : > { %p1170_p6 = por %p1310_p4, %p59_p12  ;;  %p61_p11 = por %p60_p2, %p59_p12 }
  0x46   : > { %s234_s10 = sand.u32 1, %s998_s25   ;;  %s691_s11 = sshll.u32 %s1002_s26, 7 }
  0x47   : > { %s659_s12 = sshll.u32 %s234_s10, 3  ;;  %s1183_s15 = scalar_lea.hbm %s1297_s1, %s691_s11 }
  0x48   : > { %s238_s16 = scalar_lea.vmem [#allocation3], %s659_s12  ;;  %p1187_p10 = pnand %p780_p8, %p61_p11 }
  0x49   : > { %s245_s8 = sshll.u32 %s238_s16, 4  ;;  %s1191_s18 = scalar_lea.sflag [#allocation4], %s234_s10  ;;  %s1185_s8 = int_to_ptr.vmem [resolvable:$true] %s245_s8 }
  0x4a   : > { %s902_s19 = scalar_lea.hbm %s1183_s15, 128  ;;  %p904_p0 = pneg %p1187_p10 }
  0x4b   : > { %p903_p13 = scmp.ne.s32.totalorder %s1183_s15, %s902_s19  ;;  %s907_s11 = scalar_lea.hbm %s1297_s1, 384 }
  0x4c   : > { %p908_p7 = scmp.lt.u32.totalorder %s1183_s15, %s1297_s1  ;;  %p909_p9 = scmp.lt.u32.totalorder %s907_s11, %s902_s19 }
  0x4d   : > { %p905_p3 = pnand %p904_p0, %p903_p13  ;;  %p911_p1 = scmp.lt.u32.totalorder %s902_s19, %s1183_s15 }
  0x4e   : > { %p910_p12 = por %p909_p9, %p908_p7 }
  0x4f   : > { %p906_p5 = pneg %p905_p3 }
  0x50   : > { %p912_p2 = por %p911_p1, %p910_p12 }
  0x52   : > { %p913_p4 = pnand %p912_p2, %p906_p5 }
  0x54   : > { %916 = shalt.err (!%p913_p4)
}
  0x55   : > { %s917_s10 = scalar_lea.vmem %s1185_s8, 128  ;;  %s1008_s16 = smov [#allocation3]  }
  0x56   : > { %p918_p8 = scmp.ne.s32.totalorder %s1185_s8, %s917_s10  ;;  %s922_s22 = sshll.u32 %s1008_s16, 4  ;;  %s923_s22 = int_to_ptr.vmem [resolvable:$false] %s922_s22 }
  0x57   : > { %s924_s12 = scalar_lea.vmem %s923_s22, 256  ;;  %p925_p3 = scmp.lt.s32.totalorder %s1185_s8, %s923_s22 }
  0x58   : > { %p920_p11 = pnand %p918_p8, %p904_p0  ;;  %p926_p7 = scmp.lt.s32.totalorder %s924_s12, %s917_s10 }
  0x5a   : > { %p921_p13 = pneg %p920_p11  ;;  %p927_p9 = por %p926_p7, %p925_p3 }
  0x5c   : > { %p928_p12 = pnand %p927_p9, %p921_p13 }
  0x5e   : > { %931 = shalt.err (!%p928_p12)
}
  0x5f   : > { %773 = dma.hbm_to_vmem [thread:$0]  (!%p1187_p10), %s1183_s15, 128, %s1185_s8, %s1191_s18, %s1006_s20, %s1006_s20, %s1007_s21  }
  0x60   : > { %p1313_p0 = scmp.ne.s32.totalorder %s1308_s30, 0 }
  0x61   : > { %s1225_s19 = sand.u32 (!%p1313_p0), 1, %s994_s24   ;;  %p1314_p5 = scmp.ne.s32.totalorder (!%p1313_p0), %s1306_s28, 0 }
  0x62   : > { %257 = sbr.rel (%p1313_p0) target bundleno = 607 (0x25f), region = 44  ;;  %s663_s11 = sshll.u32 (!%p1313_p0), %s1225_s19, 3 }
  0x63   : > { %s260_s13 = scalar_lea.sflag (!%p1313_p0), [#allocation4], %s1225_s19  ;;  %s1229_s14 = scalar_lea.vmem (!%p1313_p0), [#allocation3], %s663_s11 }
  0x69   : > { %977 = dma.done.wait (%p1314_p5), %s260_s13, 128  }
  0x6a   : > { %979 = vsyncadd (%p1314_p5), %s260_s13, 4294967168  ;;  %p1315_p10 = scmp.eq.s32.totalorder %s1073_s0, 0 }
  0x6c   : > { %981 = dma.done.wait (%p1315_p10), [#allocation7], 2048   ;;  %p1316_p1 = pmov %p1315_p10 }
  0x6d   : > { %v1009_v0 = vmov 0.0   ;;  %vm1010_vm0 = vmmov 0   ;;  %v824_v1 = vld [vmem:[#allocation6] sm:$0xff]   ;;  %v825_v2 = vld [vmem:[#allocation6 + $0x8] sm:$0xff]   ;;  %v826_v3 = vld [vmem:[#allocation6 + $0x10] sm:$0xff]   ;;  %s303_s28 = sld [smem:[#allocation2]] }
  0x6e   : > { %983 = vsyncadd (%p1316_p1), [#allocation7], 4294965248  ;;  %711 = vmatprep.subr.bf16.mxu0 %v1009_v0  ;;  %727 = vmatprep.mubr.msk.bf16.mxu0 %vm1010_vm0, %v1009_v0  ;;  %v833_v4 = vld [vmem:[#allocation8] sm:$0xff]   ;;  %v827_v5 = vld [vmem:[#allocation6 + $0x18] sm:$0xff]   ;;  %s666_s21 = sshll.u32 %s1225_s19, 4  ;;  %s692_s10 = sshll.u32 %s1073_s0, 8 }
  0x6f   : > { %731 = vmatprep.subr.bf16.mxu1 %v1009_v0  ;;  %747 = vmatprep.mubr.msk.bf16.mxu1 %vm1010_vm0, %v1009_v0  ;;  %v834_v6 = vld [vmem:[#allocation8 + $0x8] sm:$0xff]   ;;  %v828_v7 = vld [vmem:[#allocation6 + $0x20] sm:$0xff]   ;;  %v835_v8 = vld [vmem:[#allocation8 + $0x10] sm:$0xff]   ;;  %s299_s17 = scalar_lea.vmem [#allocation9], %s666_s21  ;;  %s1253_s12 = scalar_lea.hbm %s1302_s6, %s692_s10 }
  0x70   : > { %712 = vmatpush3.bf16.msra.mxu0 %v824_v1  ;;  %732 = vmatpush3.bf16.msra.mxu1 %v833_v4  ;;  %v829_v9 = vld [vmem:[#allocation6 + $0x28] sm:$0xff]   ;;  %v830_v10 = vld [vmem:[#allocation6 + $0x30] sm:$0xff]   ;;  %v831_v11 = vld [vmem:[#allocation6 + $0x38] sm:$0xff]   ;;  %s562_s18 = sshll.u32 %s299_s17, 4  ;;  %s549_s11 = scalar_lea.sflag [#allocation5], %s1225_s19  ;;  %s1248_s18 = int_to_ptr.vmem [resolvable:$true] %s562_s18 }
  0x71   : > { %713 = vmatprep.subr.bf16.mxu0 %v1009_v0  ;;  %733 = vmatprep.subr.bf16.mxu1 %v1009_v0  ;;  %v304_v12 = vld [vmem:[%s1229_s14] sm:$0xff]   ;;  %v837_v14 = vld [vmem:[#allocation8 + $0x20] sm:$0xff]   ;;  %v838_v15 = vld [vmem:[#allocation8 + $0x28] sm:$0xff]   ;;  %s932_s13 = scalar_lea.vmem %s1248_s18, 256  ;;  %s1011_s0 = smov [#allocation9]  }
  0x72   : > { %v836_v13 = vld [vmem:[#allocation8 + $0x18] sm:$0xff]   ;;  %v839_v16 = vld [vmem:[#allocation8 + $0x30] sm:$0xff]   ;;  %v542_v32 = vunpack.c.l.bf16 %v304_v12  ;;  %v543_v36 = vunpack.c.h.bf16 %v304_v12  ;;  %p933_p2 = scmp.ne.s32.totalorder %s1248_s18, %s932_s13  ;;  %s936_s14 = sshll.u32 %s1011_s0, 4  ;;  %s937_s14 = int_to_ptr.vmem [resolvable:$false] %s936_s14 }
  0x73   : > { %v840_v17 = vld [vmem:[#allocation8 + $0x38] sm:$0xff]   ;;  %v667_v18 = vld [vmem:[%s1299_s3] ss:$0 sm:$0xff]  ;;  %v424_v20 = vstv %s303_s28  ;;  %s938_s28 = scalar_lea.vmem %s937_s14, 512  ;;  %p939_p11 = scmp.lt.s32.totalorder %s1248_s18, %s937_s14 }
  0x74   : > { %714 = vmatpush3.bf16.msra.mxu0 %v825_v2  ;;  %734 = vmatpush3.bf16.msra.mxu1 %v834_v6  ;;  %v677_v31 = vld [vmem:[%s1301_s5] ss:$0 sm:$0xff]  ;;  %p934_p4 = pnand %p933_p2, %p1170_p6  ;;  %p940_p13 = scmp.lt.s32.totalorder %s938_s28, %s932_s13 }
  0x75   : > { %715 = vmatprep.subr.bf16.mxu0 %v1009_v0  ;;  %735 = vmatprep.subr.bf16.mxu1 %v1009_v0 }
  0x76   : > { %p935_p8 = pneg %p934_p4  ;;  %p941_p3 = por %p940_p13, %p939_p11 }
  0x78   : > { %716 = vmatpush3.bf16.msra.mxu0 %v826_v3  ;;  %736 = vmatpush3.bf16.msra.mxu1 %v835_v8  ;;  %p942_p7 = pnand %p941_p3, %p935_p8 }
  0x79   : > { %717 = vmatprep.subr.bf16.mxu0 %v1009_v0  ;;  %737 = vmatprep.subr.bf16.mxu1 %v1009_v0 }
  0x7c   : > { %718 = vmatpush3.bf16.msra.mxu0 %v827_v5  ;;  %738 = vmatpush3.bf16.msra.mxu1 %v836_v13 }
  0x7d   : > { %719 = vmatprep.subr.bf16.mxu0 %v1009_v0  ;;  %739 = vmatprep.subr.bf16.mxu1 %v1009_v0 }
  0x80   : > { %720 = vmatpush3.bf16.msra.mxu0 %v828_v7  ;;  %740 = vmatpush3.bf16.msra.mxu1 %v837_v14 }
  0x81   : > { %721 = vmatprep.subr.bf16.mxu0 %v1009_v0  ;;  %741 = vmatprep.subr.bf16.mxu1 %v1009_v0 }
  0x84   : > { %722 = vmatpush3.bf16.msra.mxu0 %v829_v9  ;;  %742 = vmatpush3.bf16.msra.mxu1 %v838_v15 }
  0x85   : > { %723 = vmatprep.subr.bf16.mxu0 %v1009_v0  ;;  %743 = vmatprep.subr.bf16.mxu1 %v1009_v0 }
  0x88   : > { %724 = vmatpush3.bf16.msra.mxu0 %v830_v10  ;;  %744 = vmatpush3.bf16.msra.mxu1 %v839_v16 }
  0x89   : > { %725 = vmatprep.subr.bf16.mxu0 %v1009_v0  ;;  %745 = vmatprep.subr.bf16.mxu1 %v1009_v0 }
  0x8c   : > { %726 = vmatpush3.bf16.msra.mxu0 %v831_v11  ;;  %746 = vmatpush3.bf16.msra.mxu1 %v840_v17 }
  0x8f   : > { %728 = vmatmul.mubr.bf16.vlgmr.msra.gmra.mrb[0].mxu0 %v304_v12 }
 0x162   : > { %v417_v19 = vpop.f32.mrb[0].mxu0 }
 0x163   : > { %v418_v21 = vadd.f32 %v667_v18, %v417_v19  ;;  %v729_v22 = vpop.f32.mrb[1].mxu0 }
 0x164   : > { %v420_v23 = vpop.f32.mrb[2].mxu0 }
 0x165   : > { %v425_v24 = vmul.f32 %v424_v20, %v418_v21  ;;  %v421_v25 = vadd.f32 %v667_v18, %v420_v23  ;;  %v730_v26 = vpop.f32.mrb[3].mxu0 }
 0x167   : > { %v426_v27 = vmul.f32 %v424_v20, %v421_v25  ;;  %842 = vtanh.f32 %v425_v24 }
 0x169   : > { %844 = vtanh.f32 %v426_v27 }
 0x171   : > { %v843_v28 = vpop.eup %842 }
 0x173   : > { %v845_v29 = vpop.eup %844 }
 0x174   : > { %v429_v30 = vpack.c.bf16 %v845_v29, %v843_v28 }
 0x176   : > { %748 = vmatmul.mubr.bf16.vlgmr.msra.gmra.mrb[0].mxu1 %v429_v30 }
 0x249   : > { %v535_v33 = vpop.f32.mrb[0].mxu1 }
 0x24a   : > { %v536_v34 = vadd.f32 %v677_v31, %v535_v33  ;;  %v749_v35 = vpop.f32.mrb[1].mxu1 }
 0x24b   : > { %v538_v37 = vpop.f32.mrb[2].mxu1 }
 0x24c   : > { %v544_v38 = vadd.f32 %v542_v32, %v536_v34  ;;  %v539_v39 = vadd.f32 %v677_v31, %v538_v37  ;;  %v750_v40 = vpop.f32.mrb[3].mxu1 }
 0x24e   : > { %546 = vst [vmem:[%s299_s17] sm:$0xff] %v544_v38  ;;  %v545_v41 = vadd.f32 %v543_v36, %v539_v39 }
 0x250   : > { %547 = vst [vmem:[%s299_s17 + $0x8] sm:$0xff] %v545_v41 }
 0x251   : > { %945 = shalt.err (!%p942_p7)
}
 0x252   : > { %s946_s30 = scalar_lea.hbm %s1253_s12, 256  ;;  %s950_s15 = scalar_lea.hbm %s1302_s6, 768 }
 0x253   : > { %p947_p9 = scmp.ne.s32.totalorder %s1253_s12, %s946_s30  ;;  %p951_p5 = scmp.lt.u32.totalorder %s1253_s12, %s1302_s6 }
 0x254   : > { %p952_p10 = scmp.lt.u32.totalorder %s950_s15, %s946_s30  ;;  %p954_p2 = scmp.lt.u32.totalorder %s946_s30, %s1253_s12 }
 0x255   : > { %p948_p12 = pnand %p947_p9, %p1170_p6 }
 0x256   : > { %p953_p1 = por %p952_p10, %p951_p5 }
 0x257   : > { %p949_p0 = pneg %p948_p12 }
 0x258   : > { %p955_p4 = por %p954_p2, %p953_p1 }
 0x25a   : > { %p956_p8 = pnand %p955_p4, %p949_p0 }
 0x25c   : > { %959 = shalt.err (!%p956_p8)
}
 0x25d   : > { %s1012_s10 = smov 128   ;;  %s1013_s16 = smov 8  }
 0x25e   : > { %761 = dma.vmem_to_hbm [thread:$0]  (%p1170_p6), %s1248_s18, 256, %s1253_s12, %s549_s11, %s1012_s10, %s1012_s10, %s1013_s16  }
 0x25f PF: > { %p783_p11 = scmp.ge.s32.totalorder %s1002_s26, 2  ;;  %s577_s22 = sand.u32 1, %s990_s23  }
 0x260   : > { %p1317_p13 = scmp.ne.s32.totalorder %s1307_s29, 0  ;;  %s578_s13 = scalar_lea.sflag [#allocation5], %s577_s22 }
 0x262   : > { %p775_p3 = pnand %p783_p11, %p1317_p13 }
 0x264   : > { %985 = dma.done.wait (!%p775_p3), %s578_s13, 256  }
 0x265   : > { %987 = vsyncadd (!%p775_p3), %s578_s13, 4294967040  ;;  %p21_p7 = scmp.ge.s32.totalorder %s1160_s9, 5   ;;  %s1318_s23 = smov %s994_s24 }
 0x266   : > { %s1319_s24 = smov %s998_s25  ;;  %s1320_s25 = smov %s1176_s7 }
 0x267   : > { %s1321_s26 = smov %s1160_s9  ;;  %23 = sbr.rel (!%p21_p7) target bundleno = 8 (0x8), region = 97 }
 0x26e   :  { %583 = vsyncpa [#allocation4], 1 }
 0x26f   :  { %585 = vsyncpa [#allocation4 + $0x1], 1 }
 0x270   :  { %586 = vsyncpa [#allocation7], 1 }
 0x271   :  { %587 = vsyncpa [#allocation5], 1 }
 0x272   :  { %589 = vsyncpa [#allocation5 + $0x1], 1 }

</bundles_post_ra>
